<compile_context>
chip_gen: v7x
topology: tpu7x:2x2x1
jax: 0.10.0
libtpu: 0.0.40
codegen_flags: <defaults>
</compile_context>

<pallas_src>
import functools

import jax
import jax.numpy as jnp
from jax import lax
from jax.experimental import pallas as pl
from jax.experimental.pallas import tpu as pltpu


# ---------------------------------------------------------------------------
# Spectral normalization of the conv weight (mirrors torch.nn.utils.
# spectral_norm forward in training mode, n_power_iterations=1).
# Plain JAX glue: the weight matrix is only (Cout, Cin*9).
# ---------------------------------------------------------------------------
def spectral_normalize(w_oihw, u, n_power_iterations=1, eps=1e-12):
    cout = w_oihw.shape[0]
    w_mat = w_oihw.reshape(cout, -1)

    def _l2n(x):
        return x / (jnp.linalg.norm(x) + eps)

    v = None
    for _ in range(n_power_iterations):
        v = _l2n(w_mat.T @ u)
        u = _l2n(w_mat @ v)
    sigma = u @ (w_mat @ v)
    return w_oihw / sigma


@functools.partial(jax.jit,
                   static_argnames=("eps", "relu_slop", "n_power_iterations"))
def dconv_block(x_nchw, w_oihw, bias, gamma, beta, u,
                *, eps=1e-5, relu_slop=0.2, n_power_iterations=1):
    N, Cin, H, W = x_nchw.shape
    Cout = w_oihw.shape[0]
    HW = H * W
    L = HW + 2 * W                      # scratch row length: 1 halo row each side

    # --- glue: spectral norm + per-kx weight packing ------------------------
    w_sn = spectral_normalize(w_oihw.astype(jnp.float32), u, n_power_iterations)
    # (Cout, Cin, ky, kx) -> (kx, Cout, ky*Cin + cin): one (Cout, 3*Cin) weight
    # block per horizontal tap so each MXU call contracts K = 3*Cin.
    w_kx = jnp.transpose(w_sn, (3, 0, 2, 1)).reshape(3, Cout, 3 * Cin)
    b2 = bias.reshape(Cout, 1).astype(jnp.float32)
    x_flat = x_nchw.reshape(N, Cin, HW).astype(jnp.float32)   # free (NCHW layout)

    # -----------------------------------------------------------------------
    # Kernel 1: 3x3 conv as 3 lane-dense (Cout,3Cin)@(3Cin,HW) MXU matmuls on
    # a row-shifted in-VMEM copy of the image + per-image [sum, sum_sq].
    # -----------------------------------------------------------------------
    def conv_stats_kernel(x_ref, w_ref, b_ref, o_ref, s_ref, xs_ref):
        # x_ref : (Cin, HW)        w_ref : (3, Cout, 3*Cin)   b_ref : (Cout, 1)
        # o_ref : (Cout, HW)       s_ref : (Cout, 2)
        # xs_ref: (3*Cin, L) persistent scratch; sublane block ky holds x
        #         shifted by one row so the three vertical taps come from ONE
        #         contiguous (3*Cin, HW) slice.
        x = x_ref[...]

        # Row-halo bands (2W lanes per side).  Tiny, re-zeroed every step
        # (megacore-safe -- see header); interior is fully rewritten below.
        zb = jnp.zeros((3 * Cin, 2 * W), jnp.float32)
        xs_ref[:, pl.ds(0, 2 * W)] = zb
        xs_ref[:, pl.ds(HW, 2 * W)] = zb

        # Interior: three row-shifted placements of the image.
        xs_ref[pl.ds(0 * Cin, Cin), pl.ds(2 * W, HW)] = x      # ky = 0 (row h-1)
        xs_ref[pl.ds(1 * Cin, Cin), pl.ds(W, HW)] = x          # ky = 1
        xs_ref[pl.ds(2 * Cin, Cin), pl.ds(0, HW)] = x          # ky = 2 (row h+1)

        # Column-wrap masks, applied ONCE to the (Cout, HW) results (not to
        # each (Cin, HW) patch): masking commutes with the Cin contraction.
        col = lax.broadcasted_iota(jnp.int32, (1, HW), 1) % W
        mask_l = (col != 0).astype(jnp.float32)        # kx == 0 reads column w-1
        mask_r = (col != W - 1).astype(jnp.float32)    # kx == 2 reads column w+1

        vc = xs_ref[:, pl.ds(W, HW)]                   # (3*Cin, HW) centre taps
        vl = xs_ref[:, pl.ds(W - 1, HW)]               # left taps
        vr = xs_ref[:, pl.ds(W + 1, HW)]               # right taps

        acc = jnp.dot(w_ref[1], vc, preferred_element_type=jnp.float32)
        acc += jnp.dot(w_ref[0], vl, preferred_element_type=jnp.float32) * mask_l
        acc += jnp.dot(w_ref[2], vr, preferred_element_type=jnp.float32) * mask_r
        acc += b_ref[...]                              # (Cout,1) lane broadcast

        o_ref[...] = acc
        # Single (Cout, 2) store of the per-image partial stats.
        # (E[x^2]-E[x]^2 fold happens in f32 glue; fine at these counts.)
        s_ref[...] = jnp.concatenate(
            [jnp.sum(acc, axis=1, keepdims=True),
             jnp.sum(acc * acc, axis=1, keepdims=True)], axis=1)

    flops1 = 2 * N * Cout * 9 * Cin * HW
    bytes1 = 4 * (N * Cin * HW + N * Cout * HW + N * Cout * 2
                  + 9 * Cout * Cin + Cout)
    conv_out, stats = pl.pallas_call(
        conv_stats_kernel,
        out_shape=(jax.ShapeDtypeStruct((N, Cout, HW), jnp.float32),
                   jax.ShapeDtypeStruct((N, Cout, 2), jnp.float32)),
        grid=(N,),
        in_specs=[
            pl.BlockSpec((None, Cin, HW), lambda n: (n, 0, 0)),
            pl.BlockSpec((3, Cout, 3 * Cin), lambda n: (0, 0, 0)),
            pl.BlockSpec((Cout, 1), lambda n: (0, 0)),
        ],
        out_specs=[
            pl.BlockSpec((None, Cout, HW), lambda n: (n, 0, 0)),
            pl.BlockSpec((None, Cout, 2), lambda n: (n, 0, 0)),
        ],
        scratch_shapes=[pltpu.VMEM((3 * Cin, L), jnp.float32)],
        compiler_params=pltpu.CompilerParams(
            dimension_semantics=("parallel",),
            vmem_limit_bytes=32 * 1024 * 1024),
        cost_estimate=pl.CostEstimate(flops=flops1, transcendentals=0,
                                      bytes_accessed=bytes1),
    )(x_flat, w_kx, b2)

    # --- glue: fold batch stats (training-mode BN, biased variance) --------
    s = jnp.sum(stats, axis=0)                         # (Cout, 2)
    count = N * HW
    mean = s[:, 0] / count
    var = jnp.maximum(s[:, 1] / count - mean * mean, 0.0)
    invstd = lax.rsqrt(var + eps)
    scale = (gamma * invstd).astype(jnp.float32)
    shift = (beta - mean * gamma * invstd).astype(jnp.float32)

    # -----------------------------------------------------------------------
    # Kernel 2: normalize + LeakyReLU over a flattened (N*Cout, HW) view in
    # big lane-dense row blocks, written in place (input_output_aliases).
    # -----------------------------------------------------------------------
    rows = N * Cout
    row_blk = rows if rows <= 1024 else 1024           # single step at test shape
    assert rows % row_blk == 0
    conv_flat = conv_out.reshape(rows, HW)
    scale_rows = jnp.broadcast_to(scale.reshape(1, Cout), (N, Cout)).reshape(rows, 1)
    shift_rows = jnp.broadcast_to(shift.reshape(1, Cout), (N, Cout)).reshape(rows, 1)

    def bn_lrelu_kernel(y_ref, sc_ref, sh_ref, o_ref):
        y = y_ref[...] * sc_ref[...] + sh_ref[...]
        o_ref[...] = jnp.where(y >= 0, y, relu_slop * y)

    flops2 = 4 * rows * HW
    bytes2 = 4 * (2 * rows * HW + 2 * rows)
    out_flat = pl.pallas_call(
        bn_lrelu_kernel,
        out_shape=jax.ShapeDtypeStruct((rows, HW), jnp.float32),
        grid=(rows // row_blk,),
        in_specs=[
            pl.BlockSpec((row_blk, HW), lambda r: (r, 0)),
            pl.BlockSpec((row_blk, 1), lambda r: (r, 0)),
            pl.BlockSpec((row_blk, 1), lambda r: (r, 0)),
        ],
        out_specs=pl.BlockSpec((row_blk, HW), lambda r: (r, 0)),
        input_output_aliases={0: 0},
        compiler_params=pltpu.CompilerParams(
            dimension_semantics=("parallel",),
            vmem_limit_bytes=32 * 1024 * 1024),
        cost_estimate=pl.CostEstimate(flops=flops2, transcendentals=0,
                                      bytes_accessed=bytes2),
    )(conv_flat, scale_rows, shift_rows)

    # TODO(synk): Dropout2d(0.8) branch of DConvBlock is not implemented
    # (module default dropout=None, so this forward matches the default).
    return out_flat.reshape(N, Cout, H, W)


# ---------------------------------------------------------------------------
# Pure-JAX reference mirroring the PyTorch module (training-mode BatchNorm,
# same spectral-norm helper).
# ---------------------------------------------------------------------------
def reference(x, w, b, gamma, beta, u,
              *, eps=1e-5, relu_slop=0.2, n_power_iterations=1):
    w_sn = spectral_normalize(w.astype(jnp.float32), u, n_power_iterations)
    y = lax.conv_general_dilated(
        x, w_sn, window_strides=(1, 1), padding=((1, 1), (1, 1)),
        dimension_numbers=("NCHW", "OIHW", "NCHW"))
    y = y + b[None, :, None, None]
    mean = jnp.mean(y, axis=(0, 2, 3))
    var = jnp.var(y, axis=(0, 2, 3))
    yn = (y - mean[None, :, None, None]) * lax.rsqrt(var + eps)[None, :, None, None]
    yn = yn * gamma[None, :, None, None] + beta[None, :, None, None]
    return jnp.where(yn >= 0, yn, relu_slop * yn)


if __name__ == "__main__":
    key = jax.random.PRNGKey(0)
    k_x, k_w, k_b, k_g, k_be, k_u = jax.random.split(key, 6)

    N, Cin, Cout, H, W = 2, 4, 8, 16, 16
    x = jax.random.normal(k_x, (N, Cin, H, W), dtype=jnp.float32)
    w = 0.1 * jax.random.normal(k_w, (Cout, Cin, 3, 3), dtype=jnp.float32)
    b = 0.1 * jax.random.normal(k_b, (Cout,), dtype=jnp.float32)
    gamma = 1.0 + 0.1 * jax.random.normal(k_g, (Cout,), dtype=jnp.float32)
    beta = 0.1 * jax.random.normal(k_be, (Cout,), dtype=jnp.float32)
    u0 = jax.random.normal(k_u, (Cout,), dtype=jnp.float32)
    u0 = u0 / (jnp.linalg.norm(u0) + 1e-12)

    out = jax.block_until_ready(dconv_block(x, w, b, gamma, beta, u0))
    ref = jax.block_until_ready(reference(x, w, b, gamma, beta, u0))

    assert out.shape == (N, Cout, H, W), out.shape
    max_err = float(jnp.max(jnp.abs(out - ref)))
    assert jnp.allclose(out, ref, rtol=1e-4, atol=1e-4), max_err

    print("KERNEL_OK")
</pallas_src>

<mosaic_0001>
module attributes {stable_mosaic.version = 11 : i64} {
  func.func @conv_stats_kernel(%arg0: i32, %arg1: memref<1x4x256xf32, #tpu.memory_space<vmem>>, %arg2: memref<3x8x12xf32, #tpu.memory_space<vmem>>, %arg3: memref<8x1xf32, #tpu.memory_space<vmem>>, %arg4: memref<1x8x256xf32, #tpu.memory_space<vmem>>, %arg5: memref<1x8x2xf32, #tpu.memory_space<vmem>>, %arg6: memref<12x288xf32, #tpu.memory_space<vmem>>) attributes {dimension_semantics = [#tpu.dimension_semantics<parallel>], iteration_bounds = array<i64: 2>, scalar_prefetch = 0 : i64, scratch_operands = 1 : i64, tpu.core_type = #tpu.core_type<tc>, window_params = [{transform_indices = @transform_0, window_bounds = array<i64: 1, 4, 256>}, {pipeline_mode = #tpu.pipeline_mode<synchronous>, transform_indices = @transform_1, window_bounds = array<i64: 3, 8, 12>}, {pipeline_mode = #tpu.pipeline_mode<synchronous>, transform_indices = @transform_2, window_bounds = array<i64: 8, 1>}, {transform_indices = @transform_3, window_bounds = array<i64: 1, 8, 256>}, {transform_indices = @transform_4, window_bounds = array<i64: 1, 8, 2>}]} {
    %c0 = arith.constant 0 : index
    %c0_0 = arith.constant 0 : index
    %c0_1 = arith.constant 0 : index
    %0 = vector.load %arg1[%c0, %c0_0, %c0_1] : memref<1x4x256xf32, #tpu.memory_space<vmem>>, vector<1x4x256xf32>
    %1 = vector.shape_cast %0 : vector<1x4x256xf32> to vector<4x256xf32>
    %cst = arith.constant 0.000000e+00 : f32
    %2 = vector.broadcast %cst : f32 to vector<12x32xf32>
    %c0_2 = arith.constant 0 : index
    %c0_3 = arith.constant 0 : index
    %3 = vector.load %arg6[%c0_2, %c0_3] : memref<12x288xf32, #tpu.memory_space<vmem>>, vector<12x32xf32>
    tpu.vector_store %arg6[%c0_2, %c0_3], %2 {strides = array<i32>} : memref<12x288xf32, #tpu.memory_space<vmem>>, vector<12x32xf32>,
    %c0_4 = arith.constant 0 : index
    %c256 = arith.constant 256 : index
    %4 = vector.load %arg6[%c0_4, %c256] : memref<12x288xf32, #tpu.memory_space<vmem>>, vector<12x32xf32>
    tpu.vector_store %arg6[%c0_4, %c256], %2 {strides = array<i32>} : memref<12x288xf32, #tpu.memory_space<vmem>>, vector<12x32xf32>,
    %c0_5 = arith.constant 0 : index
    %c32 = arith.constant 32 : index
    %5 = vector.load %arg6[%c0_5, %c32] : memref<12x288xf32, #tpu.memory_space<vmem>>, vector<4x256xf32>
    tpu.vector_store %arg6[%c0_5, %c32], %1 {strides = array<i32>} : memref<12x288xf32, #tpu.memory_space<vmem>>, vector<4x256xf32>,
    %c4 = arith.constant 4 : index
    %c16 = arith.constant 16 : index
    %6 = vector.load %arg6[%c4, %c16] : memref<12x288xf32, #tpu.memory_space<vmem>>, vector<4x256xf32>
    tpu.vector_store %arg6[%c4, %c16], %1 {strides = array<i32>} : memref<12x288xf32, #tpu.memory_space<vmem>>, vector<4x256xf32>,
    %c8 = arith.constant 8 : index
    %c0_6 = arith.constant 0 : index
    %7 = vector.load %arg6[%c8, %c0_6] : memref<12x288xf32, #tpu.memory_space<vmem>>, vector<4x256xf32>
    tpu.vector_store %arg6[%c8, %c0_6], %1 {strides = array<i32>} : memref<12x288xf32, #tpu.memory_space<vmem>>, vector<4x256xf32>,
    %8 = tpu.iota {dimensions = array<i32: 1>} : vector<1x256xi32>
    %c16_i32 = arith.constant 16 : i32
    %c0_i32 = arith.constant 0 : i32
    %9 = arith.cmpi eq, %c16_i32, %c0_i32 : i32
    %c1_i32 = arith.constant 1 : i32
    %10 = arith.select %9, %c1_i32, %c16_i32 : i32
    %11 = vector.broadcast %10 : i32 to vector<1x256xi32>
    %12 = arith.remsi %8, %11 : vector<1x256xi32>
    %c0_i32_7 = arith.constant 0 : i32
    %13 = vector.broadcast %c0_i32_7 : i32 to vector<1x256xi32>
    %14 = arith.cmpi ne, %12, %13 : vector<1x256xi32>
    %c0_i32_8 = arith.constant 0 : i32
    %15 = vector.broadcast %c0_i32_8 : i32 to vector<1x256xi32>
    %16 = arith.cmpi slt, %12, %15 : vector<1x256xi32>
    %c0_i32_9 = arith.constant 0 : i32
    %17 = arith.cmpi slt, %10, %c0_i32_9 : i32
    %18 = vector.broadcast %17 : i1 to vector<1x256xi1>
    %19 = vector.broadcast %18 : vector<1x256xi1> to vector<1x256xi1>
    %20 = arith.xori %16, %19 : vector<1x256xi1>
    %21 = arith.andi %20, %14 : vector<1x256xi1>
    %22 = vector.broadcast %10 : i32 to vector<1x256xi32>
    %23 = arith.addi %12, %22 : vector<1x256xi32>
    %24 = arith.select %21, %23, %12 : vector<1x256xi1>, vector<1x256xi32>
    %c0_i32_10 = arith.constant 0 : i32
    %25 = vector.broadcast %c0_i32_10 : i32 to vector<1x256xi32>
    %26 = arith.cmpi ne, %24, %25 : vector<1x256xi32>
    %27 = arith.extui %26 : vector<1x256xi1> to vector<1x256xi32>
    %28 = arith.sitofp %27 : vector<1x256xi32> to vector<1x256xf32>
    %c15_i32 = arith.constant 15 : i32
    %29 = vector.broadcast %c15_i32 : i32 to vector<1x256xi32>
    %30 = arith.cmpi ne, %24, %29 : vector<1x256xi32>
    %31 = arith.extui %30 : vector<1x256xi1> to vector<1x256xi32>
    %32 = arith.sitofp %31 : vector<1x256xi32> to vector<1x256xf32>
    %c0_11 = arith.constant 0 : index
    %c16_12 = arith.constant 16 : index
    %33 = vector.load %arg6[%c0_11, %c16_12] : memref<12x288xf32, #tpu.memory_space<vmem>>, vector<12x256xf32>
    %c0_13 = arith.constant 0 : index
    %c15 = arith.constant 15 : index
    %34 = vector.load %arg6[%c0_13, %c15] : memref<12x288xf32, #tpu.memory_space<vmem>>, vector<12x256xf32>
    %c0_14 = arith.constant 0 : index
    %c17 = arith.constant 17 : index
    %35 = vector.load %arg6[%c0_14, %c17] : memref<12x288xf32, #tpu.memory_space<vmem>>, vector<12x256xf32>
    %c1 = arith.constant 1 : index
    %c0_15 = arith.constant 0 : index
    %c0_16 = arith.constant 0 : index
    %36 = vector.load %arg2[%c1, %c0_15, %c0_16] : memref<3x8x12xf32, #tpu.memory_space<vmem>>, vector<1x8x12xf32>
    %37 = vector.shape_cast %36 : vector<1x8x12xf32> to vector<8x12xf32>
    %cst_17 = arith.constant dense<0.000000e+00> : vector<8x256xf32>
    %38 = tpu.matmul %37, %33, %cst_17 {dimension_numbers = #tpu.dot_dimension_numbers<[1], [0], [0], [1], [0, 0, 1, 1], [], []>} : vector<8x12xf32>, vector<12x256xf32>, vector<8x256xf32> -> vector<8x256xf32>
    %c0_18 = arith.constant 0 : index
    %c0_19 = arith.constant 0 : index
    %c0_20 = arith.constant 0 : index
    %39 = vector.load %arg2[%c0_18, %c0_19, %c0_20] : memref<3x8x12xf32, #tpu.memory_space<vmem>>, vector<1x8x12xf32>
    %40 = vector.shape_cast %39 : vector<1x8x12xf32> to vector<8x12xf32>
    %cst_21 = arith.constant dense<0.000000e+00> : vector<8x256xf32>
    %41 = tpu.matmul %40, %34, %cst_21 {dimension_numbers = #tpu.dot_dimension_numbers<[1], [0], [0], [1], [0, 0, 1, 1], [], []>} : vector<8x12xf32>, vector<12x256xf32>, vector<8x256xf32> -> vector<8x256xf32>
    %42 = vector.broadcast %28 : vector<1x256xf32> to vector<8x256xf32>
    %43 = arith.mulf %41, %42 : vector<8x256xf32>
    %44 = arith.addf %38, %43 : vector<8x256xf32>
    %c2 = arith.constant 2 : index
    %c0_22 = arith.constant 0 : index
    %c0_23 = arith.constant 0 : index
    %45 = vector.load %arg2[%c2, %c0_22, %c0_23] : memref<3x8x12xf32, #tpu.memory_space<vmem>>, vector<1x8x12xf32>
    %46 = vector.shape_cast %45 : vector<1x8x12xf32> to vector<8x12xf32>
    %cst_24 = arith.constant dense<0.000000e+00> : vector<8x256xf32>
    %47 = tpu.matmul %46, %35, %cst_24 {dimension_numbers = #tpu.dot_dimension_numbers<[1], [0], [0], [1], [0, 0, 1, 1], [], []>} : vector<8x12xf32>, vector<12x256xf32>, vector<8x256xf32> -> vector<8x256xf32>
    %48 = vector.broadcast %32 : vector<1x256xf32> to vector<8x256xf32>
    %49 = arith.mulf %47, %48 : vector<8x256xf32>
    %50 = arith.addf %44, %49 : vector<8x256xf32>
    %c0_25 = arith.constant 0 : index
    %c0_26 = arith.constant 0 : index
    %51 = vector.load %arg3[%c0_25, %c0_26] : memref<8x1xf32, #tpu.memory_space<vmem>>, vector<8x1xf32>
    %52 = vector.broadcast %51 : vector<8x1xf32> to vector<8x256xf32>
    %53 = arith.addf %50, %52 : vector<8x256xf32>
    %c0_27 = arith.constant 0 : index
    %c0_28 = arith.constant 0 : index
    %c0_29 = arith.constant 0 : index
    %54 = vector.load %arg4[%c0_27, %c0_28, %c0_29] : memref<1x8x256xf32, #tpu.memory_space<vmem>>, vector<1x8x256xf32>
    %55 = vector.shape_cast %54 : vector<1x8x256xf32> to vector<8x256xf32>
    %56 = vector.shape_cast %53 : vector<8x256xf32> to vector<1x8x256xf32>
    tpu.vector_store %arg4[%c0_27, %c0_28, %c0_29], %56 {strides = array<i32>} : memref<1x8x256xf32, #tpu.memory_space<vmem>>, vector<1x8x256xf32>,
    %cst_30 = arith.constant dense<0.000000e+00> : vector<8xf32>
    %57 = vector.multi_reduction <add>, %53, %cst_30 [1] : vector<8x256xf32> to vector<8xf32>
    %58 = vector.shape_cast %57 : vector<8xf32> to vector<8x1xf32>
    %59 = arith.mulf %53, %53 : vector<8x256xf32>
    %cst_31 = arith.constant dense<0.000000e+00> : vector<8xf32>
    %60 = vector.multi_reduction <add>, %59, %cst_31 [1] : vector<8x256xf32> to vector<8xf32>
    %61 = vector.shape_cast %60 : vector<8xf32> to vector<8x1xf32>
    %62 = tpu.concatenate %58, %61 in 1 : vector<8x1xf32>, vector<8x1xf32> -> vector<8x2xf32>
    %c0_32 = arith.constant 0 : index
    %c0_33 = arith.constant 0 : index
    %c0_34 = arith.constant 0 : index
    %63 = vector.load %arg5[%c0_32, %c0_33, %c0_34] : memref<1x8x2xf32, #tpu.memory_space<vmem>>, vector<1x8x2xf32>
    %64 = vector.shape_cast %63 : vector<1x8x2xf32> to vector<8x2xf32>
    %65 = vector.shape_cast %62 : vector<8x2xf32> to vector<1x8x2xf32>
    tpu.vector_store %arg5[%c0_32, %c0_33, %c0_34], %65 {strides = array<i32>} : memref<1x8x2xf32, #tpu.memory_space<vmem>>, vector<1x8x2xf32>,
    return
  }
  func.func @transform_0(%arg0: i32) -> (i32, i32, i32) {
    %c0_i32 = arith.constant 0 : i32
    %c0_i32_0 = arith.constant 0 : i32
    %c0_i32_1 = arith.constant 0 : i32
    return %arg0, %c0_i32, %c0_i32_0 : i32, i32, i32
  }
  func.func @transform_1(%arg0: i32) -> (i32, i32, i32) {
    %c0_i32 = arith.constant 0 : i32
    %c0_i32_0 = arith.constant 0 : i32
    %c0_i32_1 = arith.constant 0 : i32
    %c0_i32_2 = arith.constant 0 : i32
    return %c0_i32, %c0_i32_0, %c0_i32_1 : i32, i32, i32
  }
  func.func @transform_2(%arg0: i32) -> (i32, i32) {
    %c0_i32 = arith.constant 0 : i32
    %c0_i32_0 = arith.constant 0 : i32
    %c0_i32_1 = arith.constant 0 : i32
    return %c0_i32, %c0_i32_0 : i32, i32
  }
  func.func @transform_3(%arg0: i32) -> (i32, i32, i32) {
    %c0_i32 = arith.constant 0 : i32
    %c0_i32_0 = arith.constant 0 : i32
    %c0_i32_1 = arith.constant 0 : i32
    return %arg0, %c0_i32, %c0_i32_0 : i32, i32, i32
  }
  func.func @transform_4(%arg0: i32) -> (i32, i32, i32) {
    %c0_i32 = arith.constant 0 : i32
    %c0_i32_0 = arith.constant 0 : i32
    %c0_i32_1 = arith.constant 0 : i32
    return %arg0, %c0_i32, %c0_i32_0 : i32, i32, i32
  }
}

module attributes {stable_mosaic.version = 11 : i64} {
  func.func @bn_lrelu_kernel(%arg0: i32, %arg1: memref<16x256xf32, #tpu.memory_space<vmem>>, %arg2: memref<16x1xf32, #tpu.memory_space<vmem>>, %arg3: memref<16x1xf32, #tpu.memory_space<vmem>>, %arg4: memref<16x256xf32, #tpu.memory_space<vmem>>) attributes {dimension_semantics = [#tpu.dimension_semantics<parallel>], iteration_bounds = array<i64: 1>, scalar_prefetch = 0 : i64, scratch_operands = 0 : i64, tpu.core_type = #tpu.core_type<tc>, window_params = [{transform_indices = @transform_0, window_bounds = array<i64: 16, 256>}, {transform_indices = @transform_1, window_bounds = array<i64: 16, 1>}, {transform_indices = @transform_2, window_bounds = array<i64: 16, 1>}, {transform_indices = @transform_3, window_bounds = array<i64: 16, 256>}]} {
    %c0 = arith.constant 0 : index
    %c0_0 = arith.constant 0 : index
    %0 = vector.load %arg1[%c0, %c0_0] : memref<16x256xf32, #tpu.memory_space<vmem>>, vector<16x256xf32>
    %c0_1 = arith.constant 0 : index
    %c0_2 = arith.constant 0 : index
    %1 = vector.load %arg2[%c0_1, %c0_2] : memref<16x1xf32, #tpu.memory_space<vmem>>, vector<16x1xf32>
    %2 = vector.broadcast %1 : vector<16x1xf32> to vector<16x256xf32>
    %3 = arith.mulf %0, %2 : vector<16x256xf32>
    %c0_3 = arith.constant 0 : index
    %c0_4 = arith.constant 0 : index
    %4 = vector.load %arg3[%c0_3, %c0_4] : memref<16x1xf32, #tpu.memory_space<vmem>>, vector<16x1xf32>
    %5 = vector.broadcast %4 : vector<16x1xf32> to vector<16x256xf32>
    %6 = arith.addf %3, %5 : vector<16x256xf32>
    %cst = arith.constant 0.000000e+00 : f32
    %7 = vector.broadcast %cst : f32 to vector<16x256xf32>
    %8 = arith.cmpf oge, %6, %7 : vector<16x256xf32>
    %cst_5 = arith.constant 2.000000e-01 : f32
    %9 = vector.broadcast %cst_5 : f32 to vector<16x256xf32>
    %10 = arith.mulf %9, %6 : vector<16x256xf32>
    %11 = arith.select %8, %6, %10 : vector<16x256xi1>, vector<16x256xf32>
    %c0_6 = arith.constant 0 : index
    %c0_7 = arith.constant 0 : index
    %12 = vector.load %arg4[%c0_6, %c0_7] : memref<16x256xf32, #tpu.memory_space<vmem>>, vector<16x256xf32>
    tpu.vector_store %arg4[%c0_6, %c0_7], %11 {strides = array<i32>} : memref<16x256xf32, #tpu.memory_space<vmem>>, vector<16x256xf32>,
    return
  }
  func.func @transform_0(%arg0: i32) -> (i32, i32) {
    %c0_i32 = arith.constant 0 : i32
    %c0_i32_0 = arith.constant 0 : i32
    return %arg0, %c0_i32 : i32, i32
  }
  func.func @transform_1(%arg0: i32) -> (i32, i32) {
    %c0_i32 = arith.constant 0 : i32
    %c0_i32_0 = arith.constant 0 : i32
    return %arg0, %c0_i32 : i32, i32
  }
  func.func @transform_2(%arg0: i32) -> (i32, i32) {
    %c0_i32 = arith.constant 0 : i32
    %c0_i32_0 = arith.constant 0 : i32
    return %arg0, %c0_i32 : i32, i32
  }
  func.func @transform_3(%arg0: i32) -> (i32, i32) {
    %c0_i32 = arith.constant 0 : i32
    %c0_i32_0 = arith.constant 0 : i32
    return %arg0, %c0_i32 : i32, i32
  }
}

</mosaic_0001>

<bundles_post_ra>
// kernel: dconv_block.3
= control target key start
LH: loop header
LB: loop body
LE: loop exit
PB: predicated region body
PF: predicated region fallthrough
CT: control target
= control target key end

     0   :  { %v73_v0 = vmov 0   ;;  %s130_s2 = inlined_call_operand.vmem [shape: f32[16,1], index: 2, kind: input, shape index: {}]   ;;  %s131_s1 = inlined_call_operand.vmem [shape: f32[16,1], index: 1, kind: input, shape index: {}]   ;;  %s132_s0 = inlined_call_operand.vmem [shape: f32[16,256], index: 0, kind: input, shape index: {}, may-alias: {0,3}]   ;;  %s133_s3 = inlined_call_operand.vmem [shape: f32[16,256], index: 3, kind: output, shape index: {}, may-alias: {0,3}]  }
   0x1   :  { %72 = vset.pattern.permute.xlu1 %v73_v0  ;;  %71 = vset.pattern.permute.xlu0 %v73_v0  ;;  %v34_v1 = vld [vmem:[%s130_s2] sm:$0xff]  ;;  %v35_v3 = vld [vmem:[%s130_s2 + $0x8] sm:$0xff]  ;;  %v16_v13 = vld [vmem:[%s132_s0 + $0x10] sm:$0xff] }
   0x2   :  { %v18_v2 = vld [vmem:[%s131_s1] sm:$0xff]  ;;  %38 = vperm.xlu1 %72, %v34_v1   ;;  %v19_v4 = vld [vmem:[%s131_s1 + $0x8] sm:$0xff]  ;;  %v17_v14 = vld [vmem:[%s132_s0 + $0x18] sm:$0xff] }
   0x3   :  { %22 = vperm.xlu0 %71, %v18_v2   ;;  %v14_v5 = vld [vmem:[%s132_s0] sm:$0xff]  ;;  %v15_v6 = vld [vmem:[%s132_s0 + $0x8] sm:$0xff] }
   0x6   :  { %43 = vperm.xlu1 %72, %v35_v3  }
   0x7   :  { %27 = vperm.xlu0 %71, %v19_v4  }
  0x81   :  { %v39_v8 = vpop.permute.xlu1 %38 }
  0x82   :  { %v23_v7 = vpop.permute.xlu0 %22 }
  0x83   :  { %v30_v9 = vmul.f32 %v23_v7, %v14_v5  ;;  %v31_v10 = vmul.f32 %v23_v7, %v15_v6 }
  0x85   :  { %v46_v11 = vadd.f32 %v39_v8, %v30_v9  ;;  %v47_v12 = vadd.f32 %v39_v8, %v31_v10  ;;  %v44_v22 = vpop.permute.xlu1 %43 }
  0x86   :  { %v28_v15 = vpop.permute.xlu0 %27 }
  0x87   :  { %vm50_vm0 = vcmp.ge.f32.partialorder %v46_v11, 0.0  ;;  %vm51_vm1 = vcmp.ge.f32.partialorder %v47_v12, 0.0  ;;  %v54_v16 = vmul.f32 0.2, %v46_v11  ;;  %v55_v17 = vmul.f32 0.2, %v47_v12 }
  0x88   :  { %v32_v18 = vmul.f32 %v28_v15, %v16_v13  ;;  %v33_v19 = vmul.f32 %v28_v15, %v17_v14 }
  0x89   :  { %v58_v20 = vsel %vm50_vm0, %v46_v11, %v54_v16  ;;  %v59_v21 = vsel %vm51_vm1, %v47_v12, %v55_v17 }
  0x8a   :  { %62 = vst [vmem:[%s133_s3] sm:$0xff] %v58_v20  ;;  %63 = vst [vmem:[%s133_s3 + $0x8] sm:$0xff] %v59_v21  ;;  %v48_v23 = vadd.f32 %v44_v22, %v32_v18  ;;  %v49_v24 = vadd.f32 %v44_v22, %v33_v19 }
  0x8c   :  { %vm52_vm2 = vcmp.ge.f32.partialorder %v48_v23, 0.0  ;;  %vm53_vm3 = vcmp.ge.f32.partialorder %v49_v24, 0.0  ;;  %v56_v25 = vmul.f32 0.2, %v48_v23  ;;  %v57_v26 = vmul.f32 0.2, %v49_v24 }
  0x8e   :  { %v60_v27 = vsel %vm52_vm2, %v48_v23, %v56_v25  ;;  %v61_v28 = vsel %vm53_vm3, %v49_v24, %v57_v26 }
  0x8f   :  { %64 = vst [vmem:[%s133_s3 + $0x10] sm:$0xff] %v60_v27  ;;  %65 = vst [vmem:[%s133_s3 + $0x18] sm:$0xff] %v61_v28 }

// kernel: dconv_block.2
= control target key start
LH: loop header
LB: loop body
LE: loop exit
PB: predicated region body
PF: predicated region fallthrough
CT: control target
= control target key end

     0   :  { %s864_s15 = smov 0   ;;  %s955_s0 = inlined_call_operand.vmem [shape: f32[2,4,256], index: 0, kind: input, shape index: {}]   ;;  %s956_s1 = inlined_call_operand.vmem [shape: f32[3,8,12], index: 1, kind: input, shape index: {}]   ;;  %s957_s2 = inlined_call_operand.vmem [shape: f32[8,1], index: 2, kind: input, shape index: {}]   ;;  %s958_s3 = inlined_call_operand.vmem [shape: f32[2,8,256], index: 3, kind: output, shape index: {0}]   ;;  %s959_s4 = inlined_call_operand.vmem [shape: f32[2,8,2], index: 4, kind: output, shape index: {1}]  }
   0x1 LB: > { %s711_s16 = sadd.s32 4294967295, %s829_s15   ;;  %p715_p0 = scmp.ge.s32.totalorder %s829_s15, 1  ;;  %s829_s15 = sphi %s864_s15, %s15_s15  }
   0x2   : > { %p165_p1 = scmp.lt.s32.totalorder %s829_s15, 3 }
   0x4   : > { %p166_p2 = pnand %p715_p0, %p165_p1 }
   0x5   : > { %p195_p3 = scmp.lt.s32.totalorder (!%p166_p2), %s711_s16, 1  ;;  %vm210_vm0 = vcmask (!%p166_p2), 261120   ;;  %v831_v0 = vmov (!%p166_p2), 0.0   ;;  %vm212_vm1 = vcmask (!%p166_p2), 257024   ;;  %s832_s21 = smov (!%p166_p2), 32   ;;  %vm226_vm2 = vcmask (!%p166_p2), 1043712  }
   0x6   : > { %169 = sbr.rel (%p166_p2) target bundleno = 647 (0x287), region = 32  ;;  %211 = vst.msk [vmem:[#allocation2] sm:$0xff] (!%p166_p2), %vm210_vm0, %v831_v0  ;;  %214 = vst.msk [vmem:[#allocation2 + $0x10] sm:$0xff] (!%p166_p2), %vm210_vm0, %v831_v0  ;;  %394 = vmatprep.mubr.f32.mxu0 (!%p166_p2), %v831_v0  ;;  %493 = vmatprep.mubr.f32.mxu1 (!%p166_p2), %v831_v0  ;;  %s833_s22 = smov (!%p166_p2), 16   ;;  %vm240_vm3 = vcmask (!%p166_p2), 1047684   ;;  %vm235_vm4 = vcmask (!%p166_p2), 130048  }
   0x7   : > { %213 = vst.msk [vmem:[#allocation2 + $0x18] sm:$0xf] (!%p166_p2), %vm212_vm1, %v831_v0  ;;  %215 = vst.msk [vmem:[#allocation2 + $0x28] sm:$0xf] (!%p166_p2), %vm212_vm1, %v831_v0  ;;  %s834_s23 = smov (!%p166_p2), 112   ;;  %s835_s24 = smov (!%p166_p2), 113  }
   0x8   : > { %vm243_vm5 = vcmask (!%p166_p2), 130052   ;;  %s836_s25 = smov (!%p166_p2), 111   ;;  %v837_v19 = vmov (!%p166_p2), 0   ;;  %v603_v20 = vld [vmem:[%s957_s2] sm:$0xff] (!%p166_p2)  ;;  %vm314_vm6 = vcmask (!%p166_p2), 924672   ;;  %vm415_vm7 = vcmask (!%p166_p2), 916480  }
   0x9   : > { %819 = vset.pattern.permute.xlu1 (!%p166_p2), %v837_v19  ;;  %820 = vset.pattern.permute.xlu0 (!%p166_p2), %v837_v19  ;;  %vm325_vm8 = vcmask (!%p166_p2), 1043456   ;;  %vm838_vm9 = vmmov (!%p166_p2), 1   ;;  %vm514_vm11 = vcmask (!%p166_p2), 908288   ;;  %v295_v54 = vld [vmem:[%s956_s1] sm:$0xff] (!%p166_p2)  ;;  %vm321_vm12 = vcmask (!%p166_p2), 97280  }
   0xa   : > { %vm901_vm10 = vmpackc.low (!%p166_p2), %vm325_vm8, %vm838_vm9 }
   0xd   : > { %s963_s16 = smov (!%p195_p3, %s711_s16), 1 }
   0xe   : > { %s738_s17 = sshll.u32 %s963_s16, 3  ;;  %v292_v4 = vld [vmem:[#allocation2 + $0x28] sm:$0xf]  ;;  %s739_s8 = sshll.u32 %s963_s16, 4 }
   0xf   : > { %s199_s20 = scalar_lea.vmem %s955_s0, %s738_s17  ;;  %s204_s11 = scalar_lea.vmem %s958_s3, %s739_s8 }
  0x10   : > { %v209_v1 = vld [vmem:[%s199_s20] sm:$0xff]  ;;  %s208_s14 = scalar_lea.vmem %s959_s4, %s738_s17 }
  0x11   : > { %218 = vrot.lane.b32.xlu0 %v209_v1, %s832_s21  ;;  %v230_v2 = vcombine.low %v209_v1, %v209_v1  ;;  %v217_v3 = vcombine.high %v209_v1, %v209_v1  ;;  %246 = vst [vmem:[#allocation2 + $0x18] sm:$0xf] %v209_v1 }
  0x13   : > { %231 = vrot.lane.b32.xlu1 %v230_v2, %s833_s22  ;;  %247 = vst [vmem:[#allocation2 + $0x20] sm:$0xf] %v217_v3 }
  0x15   : > { %220 = vrot.lane.b32.xlu0 %v217_v3, %s832_s21 }
  0x17   : > { %233 = vrot.lane.b32.xlu1 %v209_v1, %s833_s22 }
  0x18   : > { %v290_v13 = vld [vmem:[#allocation2 + $0x18] sm:$0xf] }
  0x1a   : > { %v291_v5 = vld [vmem:[#allocation2 + $0x20] sm:$0xf] }
  0x1b   : > { %v779_v6 = vpack.i.bf16 %v292_v4, %v291_v5  ;;  %v725_v5 = vld [vmem:[%s956_s1 + $0x8] sm:$0xff] }
  0x1d   : > { %780 = vrot.lane.b32.xlu0 %v779_v6, %s834_s23  ;;  %775 = vrot.lane.b32.xlu1 %v779_v6, %s835_s24 }
  0x83   : > { %v219_v7 = vpop.permute.xlu0 %218 }
  0x84   : > { %227 = vst.msk [vmem:[#allocation2] sm:$0xf] %vm226_vm2, %v219_v7  ;;  %vm623_vm2 = vcmask 15360  }
  0x85   : > { %v232_v8 = vpop.permute.xlu1 %231 }
  0x86   : > { %241 = vst.msk [vmem:[#allocation2] sm:$0xf0] %vm240_vm3, %v232_v8 }
  0x87   : > { %v221_v9 = vpop.permute.xlu0 %220 }
  0x88   : > { %v222_v10 = vsel %vm210_vm0, %v219_v7, %v221_v9  ;;  %229 = vst.msk [vmem:[#allocation2 + $0x10] sm:$0xf] %vm212_vm1, %v221_v9  ;;  %v248_v7 = vlaneseq  ;;  %vm621_vm1 = vcmask 7168  }
  0x89   : > { %228 = vst [vmem:[#allocation2 + $0x8] sm:$0xf] %v222_v10  ;;  %v234_v11 = vpop.permute.xlu1 %233 }
  0x8a   : > { %v236_v12 = vsel %vm235_vm4, %v232_v8, %v234_v11  ;;  %244 = vst.msk [vmem:[#allocation2 + $0x10] sm:$0xf0] %vm243_vm5, %v234_v11  ;;  %v249_v8 = vand.u32 127, %v248_v7 }
  0x8b   : > { %242 = vst [vmem:[#allocation2 + $0x8] sm:$0xf0] %v236_v12 }
  0x8c   : > { %v250_v9 = vadd.s32 128, %v249_v8  ;;  %v255_v10 = vand.u32 15, %v249_v8 }
  0x8d   : > { %v287_v14 = vld [vmem:[#allocation2] sm:$0xff] }
  0x8e   : > { %v784_v15 = vpack.i.bf16 %v290_v13, %v287_v14  ;;  %v262_v11 = vand.u32 15, %v250_v9  ;;  %vm275_vm13 = vcmp.ne.s32.totalorder %v255_v10, 0  ;;  %vm281_vm15 = vcmp.ne.s32.totalorder %v255_v10, 15 }
  0x8f   : > { %v781_v21 = vpop.permute.xlu0 %780  ;;  %v776_v22 = vpop.permute.xlu1 %775  ;;  %v721_v14 = vsel %vm275_vm13, 1.0, %v831_v0 }
  0x90   : > { %785 = vrot.lane.b32.xlu0 %v784_v15, %s835_s24  ;;  %v783_v24 = vunpack.i.h.bf16 %v781_v21  ;;  %v782_v25 = vunpack.i.l.bf16 %v781_v21  ;;  %v778_v26 = vunpack.i.h.bf16 %v776_v22  ;;  %v777_v27 = vunpack.i.l.bf16 %v776_v22 }
  0x91   : > { %v289_v16 = vld [vmem:[#allocation2 + $0x10] sm:$0xff]  ;;  %vm276_vm14 = vcmp.ne.s32.totalorder %v262_v11, 0  ;;  %vm282_vm0 = vcmp.ne.s32.totalorder %v262_v11, 15 }
  0x92   : > { %v288_v17 = vld [vmem:[#allocation2 + $0x8] sm:$0xff]  ;;  %v318_v36 = vsel %vm314_vm6, %v777_v27, %v778_v26  ;;  %v419_v37 = vsel %vm415_vm7, %v782_v25, %v783_v24 }
  0x93   : > { %v789_v18 = vpack.i.bf16 %v289_v16, %v288_v17  ;;  %v723_v16 = vsel %vm281_vm15, 1.0, %v831_v0 }
  0x95   : > { %790 = vrot.lane.b32.xlu0 %v789_v18, %s835_s24  ;;  %800 = vrot.lane.b32.xlu1 %v789_v18, %s834_s23 }
  0x99   : > { %795 = vrot.lane.b32.xlu0 %v779_v6, %s836_s25  ;;  %805 = vrot.lane.b32.xlu1 %v789_v18, %s836_s25  ;;  %v732_v6 = vld [vmem:[%s956_s1 + $0x10] sm:$0xff]  ;;  %v724_v18 = vsel %vm282_vm0, 1.0, %v831_v0 }
  0x9d   : > { %815 = vrot.lane.b32.xlu0 %v784_v15, %s836_s25  ;;  %810 = vrot.lane.b32.xlu1 %v784_v15, %s834_s23  ;;  %v722_v15 = vsel %vm276_vm14, 1.0, %v831_v0 }
  0xa1   : > { %606 = vperm.xlu1 %819, %v603_v20  }
 0x102   : > { %v786_v23 = vpop.permute.xlu0 %785 }
 0x103   : > { %v788_v28 = vunpack.i.h.bf16 %v786_v23  ;;  %v787_v29 = vunpack.i.l.bf16 %v786_v23 }
 0x105   : > { %v317_v42 = vsel %vm314_vm6, %v788_v28, %v777_v27 }
 0x107   : > { %v791_v30 = vpop.permute.xlu0 %790  ;;  %v801_v31 = vpop.permute.xlu1 %800 }
 0x108   : > { %v793_v32 = vunpack.i.h.bf16 %v791_v30  ;;  %v792_v33 = vunpack.i.l.bf16 %v791_v30  ;;  %v803_v34 = vunpack.i.h.bf16 %v801_v31  ;;  %v802_v35 = vunpack.i.l.bf16 %v801_v31 }
 0x10a   : > { %v316_v38 = vsel %vm314_vm6, %v792_v33, %v793_v32  ;;  %v417_v40 = vsel %vm415_vm7, %v802_v35, %v803_v34  ;;  %v315_v41 = vsel %vm314_vm6, %v787_v29, %v792_v33 }
 0x10b   : > { %v796_v43 = vpop.permute.xlu0 %795  ;;  %v806_v44 = vpop.permute.xlu1 %805  ;;  %v740_v45 = vpack.c.bf16 %v318_v36, %v316_v38  ;;  %v746_v46 = vpack.c.bf16 %v419_v37, %v417_v40  ;;  %v743_v47 = vpack.c.bf16 %v317_v42, %v315_v41 }
 0x10c   : > { %v798_v48 = vunpack.i.h.bf16 %v796_v43  ;;  %v797_v49 = vunpack.i.l.bf16 %v796_v43  ;;  %v808_v50 = vunpack.i.h.bf16 %v806_v44  ;;  %v807_v51 = vunpack.i.l.bf16 %v806_v44 }
 0x10d   : > { %742 = vmatprep.subr.msk.bf16.mxu0 %vm901_vm10, %v740_v45  ;;  %748 = vmatprep.subr.msk.bf16.mxu1 %vm901_vm10, %v746_v46 }
 0x10e   : > { %v518_v52 = vsel %vm514_vm11, %v797_v49, %v798_v48  ;;  %v516_v53 = vsel %vm514_vm11, %v807_v51, %v808_v50  ;;  %745 = vmatpush1.bf16.msk.msra.mxu0 %vm901_vm10, %v743_v47 }
 0x10f   : > { %v752_v55 = vpack.c.bf16 %v518_v52, %v516_v53  ;;  %v816_v56 = vpop.permute.xlu0 %815  ;;  %v811_v57 = vpop.permute.xlu1 %810 }
 0x110   : > { %v818_v58 = vunpack.i.h.bf16 %v816_v56  ;;  %v817_v59 = vunpack.i.l.bf16 %v816_v56  ;;  %v813_v60 = vunpack.i.h.bf16 %v811_v57  ;;  %v812_v61 = vunpack.i.l.bf16 %v811_v57 }
 0x111   : > { %754 = vmatprep.subr.msk.bf16.mxu0 %vm901_vm10, %v752_v55  ;;  %728 = vmatmul.mubr.msk.f32.vlgmr.msra.gmra.mrb[0].mxu0 %vm321_vm12, %v295_v54 }
 0x112   : > { %v515_v62 = vsel %vm514_vm11, %v817_v59, %v807_v51  ;;  %v517_v63 = vsel %vm514_vm11, %v818_v58, %v797_v49  ;;  %v416_v1 = vsel %vm415_vm7, %v812_v61, %v802_v35  ;;  %v418_v2 = vsel %vm415_vm7, %v813_v60, %v782_v25  ;;  %592 = vmatprep.mubr.f32.mxu0 %v831_v0 }
 0x113   : > { %v755_v3 = vpack.c.bf16 %v517_v63, %v515_v62  ;;  %v749_v4 = vpack.c.bf16 %v418_v2, %v416_v1 }
 0x115   : > { %751 = vmatpush1.bf16.msk.msra.mxu1 %vm901_vm10, %v749_v4  ;;  %757 = vmatpush1.bf16.msk.msra.mxu0 %vm901_vm10, %v755_v3 }
 0x118   : > { %731 = vmatmul.mubr.msk.f32.vlgmr.msra.gmra.mrb[0].mxu1 %vm321_vm12, %v725_v5  ;;  %735 = vmatmul.mubr.msk.f32.vlgmr.msra.gmra.mrb[2].mxu0 %vm321_vm12, %v732_v6 }
 0x120   : > { %v607_v28 = vpop.permute.xlu1 %606 }
 0x1e4   : > { %v396_v12 = vpop.f32.mrb[0].mxu0 }
 0x1e5   : > { %v398_v13 = vpop.f32.mrb[1].mxu0  ;;  %v401_v17 = vmul.f32 %v721_v14, %v396_v12 }
 0x1e6   : > { %v402_v19 = vmul.f32 %v722_v15, %v398_v13 }
 0x1eb   : > { %v495_v20 = vpop.f32.mrb[0].mxu1  ;;  %v594_v21 = vpop.f32.mrb[2].mxu0 }
 0x1ec   : > { %v496_v22 = vadd.f32 %v495_v20, %v401_v17  ;;  %v599_v23 = vmul.f32 %v723_v16, %v594_v21  ;;  %v497_v24 = vpop.f32.mrb[1].mxu1  ;;  %v596_v25 = vpop.f32.mrb[3].mxu0 }
 0x1ed   : > { %v498_v26 = vadd.f32 %v497_v24, %v402_v19  ;;  %v600_v27 = vmul.f32 %v724_v18, %v596_v25 }
 0x1ee   : > { %v601_v29 = vadd.f32 %v599_v23, %v496_v22 }
 0x1ef   : > { %v602_v30 = vadd.f32 %v600_v27, %v498_v26 }
 0x1f0   : > { %v609_v31 = vadd.f32 %v607_v28, %v601_v29 }
 0x1f1   : > { %v610_v0 = vadd.f32 %v607_v28, %v602_v30 }
 0x1f2   : > { %611 = vst [vmem:[%s204_s11] sm:$0xff] %v609_v31  ;;  %v616_v32 = vmul.f32 %v609_v31, %v609_v31 }
 0x1f3   : > { %612 = vst [vmem:[%s204_s11 + $0x8] sm:$0xff] %v610_v0  ;;  %v613_v33 = vadd.f32 %v610_v0, %v609_v31  ;;  %v617_v34 = vmul.f32 %v610_v0, %v610_v0 }
 0x1f5   : > { %614 = vadd.xlane.f32.xlu0 %v613_v33  ;;  %v618_v35 = vadd.f32 %v617_v34, %v616_v32 }
 0x1f7   : > { %619 = vadd.xlane.f32.xlu1 %v618_v35 }
 0x282   : > { %v615_v36 = vpop.xlane.xlu0 %614 }
 0x284   : > { %v620_v37 = vpop.xlane.xlu1 %619 }
 0x285   : > { %v622_v38 = vsel %vm621_vm1, %v615_v36, %v620_v37 }
 0x286   : > { %624 = vst.msk [vmem:[%s208_s14] sm:$0xff] %vm623_vm2, %v622_v38 }
 0x287 PF: > { %s15_s15 = sadd.s32 1, %s829_s15  }
 0x288   : > { %p12_p4 = scmp.ge.s32.totalorder %s15_s15, 4  }
 0x28a   :  { %14 = sbr.rel (!%p12_p4) target bundleno = 1 (0x1), region = 76 }

</bundles_post_ra>
